<compile_context>
chip_gen: v5e
topology: v5e:2x2
jax: 0.10.0
libtpu: 0.0.40
codegen_flags: <defaults>
</compile_context>

<pallas_src>
import math
import functools

import numpy as np
import jax
import jax.numpy as jnp
from jax.experimental import pallas as pl
from jax.experimental.pallas import tpu as pltpu


# ----------------------------- in-kernel helpers -----------------------------

def _gelu(x):
    # exact (erf-based) GELU, matching torch.nn.GELU() default
    return 0.5 * x * (1.0 + jax.lax.erf(x * (1.0 / math.sqrt(2.0))))


def _layernorm(x, g, b, eps=1e-5):
    mu = jnp.mean(x, axis=-1, keepdims=True)
    var = jnp.mean((x - mu) ** 2, axis=-1, keepdims=True)
    return (x - mu) * jax.lax.rsqrt(var + eps) * g + b


# ------------------------------- fused kernel --------------------------------
# emb Linear -> GELU -> +pos-enc -> MultiheadAttention (over batch axis) ->
# add&norm -> FF(relu) -> add&norm -> flatten (B, S*E) -> gelu(L1) -> gelu(L2)
# -> L3 -> min(x, 0)

def _fused_kernel(dims, off_d, off_8, off_16,
                  data_ref, w8_ref, w16_ref, o_ref):
    B, S, I, E, H, FF, HALF, HID = dims
    hd = E // H
    scale = 1.0 / math.sqrt(hd)

    # Load the three packed slabs once; unpack with static (free) slices.
    data = data_ref[...]          # (B*S, I+E)
    w8 = w8_ref[...]              # (8, n8)
    w16 = w16_ref[...]            # (B*S, n16)

    def d(name):
        r, c0, c1 = off_d[name]
        return data[0:r, c0:c1]

    def p8(name):
        r, c0, c1 = off_8[name]
        return w8[0:r, c0:c1]

    def p16(name):
        r, c0, c1 = off_16[name]
        return w16[0:r, c0:c1]

    # ---- embedding + GELU + positional encoding (pe pre-tiled: row b*S+s -> pe[s]) ----
    h = _gelu(jnp.dot(d("x"), p8("w_emb"),
                      preferred_element_type=jnp.float32) + p8("b_emb")) + d("pe")

    # ---- self-attention over the batch axis (len B), batched over (s, head) -----------
    qkv = jnp.dot(h, p8("w_qkv"), preferred_element_type=jnp.float32) + p8("b_qkv")
    q = qkv[:, 0:E] * scale                                           # (B*S, E)
    kv = qkv[:, E:3 * E]                                              # (B*S, 2E)

    # Column block j of K_all/V_all holds k/v of batch (b -/+ j) mod B at the same s:
    # a per-row permutation of the B keys, harmless under softmax.  One XLU sublane
    # roll per j replaces the old slice + sublane-concat constructions.
    # TODO(synk): switch these static Python loops to lax.fori_loop(unroll=True) if B grows.
    rolled = [kv] + [pltpu.roll(kv, j * S, axis=0) for j in range(1, B)]
    k_all = jnp.concatenate([r_[:, 0:E] for r_ in rolled], axis=1)    # (B*S, B*E)
    v_all = jnp.concatenate([r_[:, E:2 * E] for r_ in rolled], axis=1)
    q_all = jnp.concatenate([q] * B, axis=1)                          # (B*S, B*E)

    # One MXU matmul for all B*H score columns (block-diagonal head-sum matrix).
    scores = jnp.dot(q_all * k_all, p8("hs_bd"),
                     preferred_element_type=jnp.float32)              # (B*S, B*H)

    # Softmax over j (the B lane-blocks of width H).
    sj = [scores[:, j * H:(j + 1) * H] for j in range(B)]
    m = functools.reduce(jnp.maximum, sj)
    ej = [jnp.exp(s_ - m) for s_ in sj]
    denom = functools.reduce(lambda a, b: a + b, ej)
    inv = pl.reciprocal(denom, approx=True)   # EUP slot; use exact div for bit parity
    p_all = jnp.concatenate([e_ * inv for e_ in ej], axis=1)          # (B*S, B*H)

    # Head-broadcast + weighted-V + lane-fold: two MXU matmuls, no per-j loop.
    ctx = jnp.dot(jnp.dot(p_all, p8("he_bd"),
                          preferred_element_type=jnp.float32) * v_all,
                  p8("fold"), preferred_element_type=jnp.float32)     # (B*S, E)

    attn = jnp.dot(ctx, p8("w_out"),
                   preferred_element_type=jnp.float32) + p8("b_out")  # (B*S, E)

    # ---- residual + norm1, feed-forward (relu), residual + norm2 (full block) ---------
    src = _layernorm(h + attn, p8("g1"), p8("be1"))
    ff = jnp.maximum(jnp.dot(src, p8("w_ff1"),
                             preferred_element_type=jnp.float32) + p8("b_ff1"), 0.0)
    ff = jnp.dot(ff, p8("w_ff2"), preferred_element_type=jnp.float32) + p8("b_ff2")
    enc = _layernorm(src + ff, p8("g2"), p8("be2"))                   # (B*S, E)

    # ---- MLP head with the (B, S*E) flatten folded into a lane-dense matmul -----------
    # P[r, s*HALF+m] = <enc[r,:], w_a1[s*E:(s+1)*E, m]>; mask keeps s == r%S; ROWSEL sums
    # the S rows of each batch; the S lane-blocks of width HALF are folded with a log-tree
    # of lane rolls (XLU) — no 0/1 fold matrix, no extra DMA.
    pmat = jnp.dot(enc, p8("w_a1_cat"),
                   preferred_element_type=jnp.float32) * p16("head_mask")   # (B*S, S*HALF)
    qrow = jnp.dot(p8("rowsel"), pmat,
                   preferred_element_type=jnp.float32)                      # (B, S*HALF)
    if S & (S - 1) == 0:                       # power-of-two S: log-tree lane fold
        shift = (S * HALF) // 2
        while shift >= HALF:
            qrow = qrow + pltpu.roll(qrow, shift, axis=1)
            shift //= 2
        a1_pre = qrow[:, 0:HALF]
    else:                                      # generic fallback: slice-and-add
        a1_pre = functools.reduce(
            lambda a, b: a + b,
            [qrow[:, s * HALF:(s + 1) * HALF] for s in range(S)])

    a1 = _gelu(a1_pre + p8("b_a1"))                                          # (B, HALF)
    a2 = _gelu(jnp.dot(a1, p16("w_a2"),
                       preferred_element_type=jnp.float32) + p8("b_a2"))     # (B, HID)
    y = jnp.dot(a2, p16("w_a3"),
                preferred_element_type=jnp.float32) + p8("b_a3")             # (B, 1)
    o_ref[...] = jnp.minimum(y, 0.0)                                         # == -relu(-y)


# --------------------------------- wrapper ------------------------------------

def super_investor_forward(x, params, nheads):
    B, S, I = x.shape
    E = params["w_emb"].shape[1]
    FF = params["w_ff1"].shape[1]
    HALF = params["w_a1"].shape[1]
    HID = params["w_a2"].shape[1]
    H = nheads
    assert E % H == 0
    hd = E // H
    f32 = jnp.float32

    # ------------- layout plumbing, done once in the wrapper (cheap under jit) ---------
    x2 = x.reshape(B * S, I).astype(f32)
    pe_t = jnp.tile(params["pe"], (B, 1))                  # row b*S+s -> pe[s]

    # w_a1 row-blocks lane-concatenated: w_a1_cat[:, s*HALF:(s+1)*HALF] = w_a1[s*E:(s+1)*E, :]
    w_a1_cat = (params["w_a1"].reshape(S, E, HALF)
                .transpose(1, 0, 2).reshape(E, S * HALF))

    # 0/1 selection matrices (host constants; packed into the weight slab -> no in-kernel iota)
    e_i = np.arange(B * E)
    h_i = np.arange(B * H)
    hs_bd = ((e_i[:, None] // E == h_i[None, :] // H)
             & ((e_i[:, None] % E) // hd == h_i[None, :] % H)).astype(np.float32)  # (B*E, B*H)
    he_bd = hs_bd.T                                                                 # (B*H, B*E)
    fold = np.tile(np.eye(E, dtype=np.float32), (B, 1))                             # (B*E, E)
    rowsel = np.kron(np.eye(B, dtype=np.float32),
                     np.ones((1, S), dtype=np.float32))                             # (B, B*S)
    r_i = np.arange(B * S)
    c_i = np.arange(S * HALF)
    head_mask = ((r_i[:, None] % S) == (c_i[None, :] // HALF)).astype(np.float32)   # (B*S, S*HALF)

    def pack(pieces, rows):
        off, cols, cur = {}, [], 0
        for name, a in pieces:
            a = jnp.asarray(a, f32)
            r, c = a.shape
            if r < rows:
                a = jnp.pad(a, ((0, rows - r), (0, 0)))
            off[name] = (r, cur, cur + c)
            cols.append(a)
            cur += c
        return jnp.concatenate(cols, axis=1), off

    data, off_d = pack([("x", x2), ("pe", pe_t)], B * S)

    pieces8 = [
        ("w_emb", params["w_emb"]), ("b_emb", params["b_emb"]),
        ("w_qkv", params["w_qkv"]), ("b_qkv", params["b_qkv"]),
        ("w_out", params["w_attnout"]), ("b_out", params["b_attnout"]),
        ("g1", params["g1"]), ("be1", params["be1"]),
        ("w_ff1", params["w_ff1"]), ("b_ff1", params["b_ff1"]),
        ("w_ff2", params["w_ff2"]), ("b_ff2", params["b_ff2"]),
        ("g2", params["g2"]), ("be2", params["be2"]),
        ("w_a1_cat", w_a1_cat), ("b_a1", params["b_a1"]),
        ("b_a2", params["b_a2"]), ("b_a3", params["b_a3"]),
        ("hs_bd", hs_bd), ("he_bd", he_bd), ("fold", fold), ("rowsel", rowsel),
    ]
    rows8 = max(8, max(int(np.shape(a)[0]) for _, a in pieces8))
    w8, off_8 = pack(pieces8, rows8)

    w16, off_16 = pack([
        ("w_a2", params["w_a2"]), ("w_a3", params["w_a3"]), ("head_mask", head_mask),
    ], B * S)

    dims = (B, S, I, E, H, FF, HALF, HID)
    vmem = pl.BlockSpec(memory_space=pltpu.MemorySpace.VMEM)

    out = pl.pallas_call(
        functools.partial(_fused_kernel, dims, off_d, off_8, off_16),
        out_shape=jax.ShapeDtypeStruct((B, 1), f32),
        in_specs=[vmem, vmem, vmem],
        out_specs=vmem,
    )(data, w8, w16)
    return out


# ------------------------------ parameter init --------------------------------

def init_params(key, input_dim=6, seq_length=8, emb_dim=4, hidden_dim=16,
                nheads=2, peps=0.01):
    # weights stored in (in, out) layout (i.e. PyTorch weight transposed)
    ks = jax.random.split(key, 8)

    def kaiming(k, fan_in, shape):                # kaiming_uniform_, a=0, fan_in mode
        bound = math.sqrt(6.0 / fan_in)
        return jax.random.uniform(k, shape, jnp.float32, -bound, bound)

    def xavier(k, fan_in, fan_out, shape):
        bound = math.sqrt(6.0 / (fan_in + fan_out))
        return jax.random.uniform(k, shape, jnp.float32, -bound, bound)

    E, FF = emb_dim, int(emb_dim * 2)
    tshape = seq_length * emb_dim

    params = {
        # emb_net
        "w_emb": kaiming(ks[0], input_dim, (input_dim, E)),
        "b_emb": jnp.zeros((1, E), jnp.float32),
        # MultiheadAttention in_proj (xavier by default, bias zero)
        "w_qkv": xavier(ks[1], E, 3 * E, (E, 3 * E)),
        "b_qkv": jnp.zeros((1, 3 * E), jnp.float32),
        # MultiheadAttention out_proj (hit by the kaiming init loop)
        "w_attnout": kaiming(ks[2], E, (E, E)),
        "b_attnout": jnp.zeros((1, E), jnp.float32),
        # layer norms
        "g1": jnp.ones((1, E), jnp.float32), "be1": jnp.zeros((1, E), jnp.float32),
        "g2": jnp.ones((1, E), jnp.float32), "be2": jnp.zeros((1, E), jnp.float32),
        # encoder feed-forward
        "w_ff1": kaiming(ks[3], E, (E, FF)),
        "b_ff1": jnp.zeros((1, FF), jnp.float32),
        "w_ff2": kaiming(ks[4], FF, (FF, E)),
        "b_ff2": jnp.zeros((1, E), jnp.float32),
        # MLP head
        "w_a1": kaiming(ks[5], tshape, (tshape, tshape // 2)),
        "b_a1": jnp.zeros((1, tshape // 2), jnp.float32),
        "w_a2": kaiming(ks[6], tshape // 2, (tshape // 2, hidden_dim)),
        "b_a2": jnp.zeros((1, hidden_dim), jnp.float32),
        "w_a3": kaiming(ks[7], hidden_dim, (hidden_dim, 1)),
        "b_a3": jnp.zeros((1, 1), jnp.float32),
    }

    # positional encoding buffer (sin/cos interleaved, scaled by peps), shape (S, E)
    position = jnp.arange(seq_length, dtype=jnp.float32)[:, None]
    div_term = jnp.exp(jnp.arange(0, E, 2, dtype=jnp.float32)
                       * (-math.log(10000.0) / E))
    pe = jnp.zeros((seq_length, E), jnp.float32)
    pe = pe.at[:, 0::2].set(jnp.sin(position * div_term))
    pe = pe.at[:, 1::2].set(jnp.cos(position * div_term))
    params["pe"] = pe * peps
    return params


# ------------------------------------ main -------------------------------------

if __name__ == "__main__":
    B, S, I_DIM, E, HID, NH = 2, 8, 6, 4, 16, 2   # small shapes consistent with the module

    key = jax.random.PRNGKey(0)
    k_param, k_x = jax.random.split(key)
    params = init_params(k_param, input_dim=I_DIM, seq_length=S,
                         emb_dim=E, hidden_dim=HID, nheads=NH)
    x = jax.random.normal(k_x, (B, S, I_DIM), dtype=jnp.float32)

    out = super_investor_forward(x, params, NH)
    out = jax.block_until_ready(out)
    assert out.shape == (B, 1)
    assert bool(jnp.all(out <= 0.0))              # -relu(-x) is always <= 0
    print("KERNEL_OK")
</pallas_src>

<mosaic_0001>
module attributes {stable_mosaic.version = 11 : i64} {
  func.func @_fused_kernel(%arg0: memref<16x10xf32, #tpu.memory_space<vmem>>, %arg1: memref<8x273xf32, #tpu.memory_space<vmem>>, %arg2: memref<16x145xf32, #tpu.memory_space<vmem>>, %arg3: memref<2x1xf32, #tpu.memory_space<vmem>>) attributes {dimension_semantics = [], scalar_prefetch = 0 : i64, scratch_operands = 0 : i64, tpu.core_type = #tpu.core_type<tc>} {
    %c0 = arith.constant 0 : index
    %c0_0 = arith.constant 0 : index
    %0 = vector.load %arg0[%c0, %c0_0] : memref<16x10xf32, #tpu.memory_space<vmem>>, vector<16x10xf32>
    %c0_1 = arith.constant 0 : index
    %c0_2 = arith.constant 0 : index
    %1 = vector.load %arg1[%c0_1, %c0_2] : memref<8x273xf32, #tpu.memory_space<vmem>>, vector<8x273xf32>
    %c0_3 = arith.constant 0 : index
    %c0_4 = arith.constant 0 : index
    %2 = vector.load %arg2[%c0_3, %c0_4] : memref<16x145xf32, #tpu.memory_space<vmem>>, vector<16x145xf32>
    %3 = vector.extract_strided_slice %0 {offsets = [0, 0], sizes = [16, 6], strides = [1, 1]} : vector<16x10xf32> to vector<16x6xf32>
    %4 = vector.extract_strided_slice %1 {offsets = [0, 0], sizes = [6, 4], strides = [1, 1]} : vector<8x273xf32> to vector<6x4xf32>
    %cst = arith.constant dense<0.000000e+00> : vector<16x4xf32>
    %5 = tpu.matmul %3, %4, %cst {dimension_numbers = #tpu.dot_dimension_numbers<[1], [0], [0], [1], [0, 0, 1, 1], [], []>} : vector<16x6xf32>, vector<6x4xf32>, vector<16x4xf32> -> vector<16x4xf32>
    %6 = vector.extract_strided_slice %1 {offsets = [0, 4], sizes = [1, 4], strides = [1, 1]} : vector<8x273xf32> to vector<1x4xf32>
    %7 = vector.broadcast %6 : vector<1x4xf32> to vector<16x4xf32>
    %8 = arith.addf %5, %7 : vector<16x4xf32>
    %cst_5 = arith.constant 5.000000e-01 : f32
    %9 = vector.broadcast %cst_5 : f32 to vector<16x4xf32>
    %10 = arith.mulf %9, %8 : vector<16x4xf32>
    %cst_6 = arith.constant 0.707106769 : f32
    %11 = vector.broadcast %cst_6 : f32 to vector<16x4xf32>
    %12 = arith.mulf %8, %11 : vector<16x4xf32>
    %13 = math.erf %12 : vector<16x4xf32>
    %cst_7 = arith.constant 1.000000e+00 : f32
    %14 = vector.broadcast %cst_7 : f32 to vector<16x4xf32>
    %15 = arith.addf %14, %13 : vector<16x4xf32>
    %16 = arith.mulf %10, %15 : vector<16x4xf32>
    %17 = vector.extract_strided_slice %0 {offsets = [0, 6], sizes = [16, 4], strides = [1, 1]} : vector<16x10xf32> to vector<16x4xf32>
    %18 = arith.addf %16, %17 : vector<16x4xf32>
    %19 = vector.extract_strided_slice %1 {offsets = [0, 8], sizes = [4, 12], strides = [1, 1]} : vector<8x273xf32> to vector<4x12xf32>
    %cst_8 = arith.constant dense<0.000000e+00> : vector<16x12xf32>
    %20 = tpu.matmul %18, %19, %cst_8 {dimension_numbers = #tpu.dot_dimension_numbers<[1], [0], [0], [1], [0, 0, 1, 1], [], []>} : vector<16x4xf32>, vector<4x12xf32>, vector<16x12xf32> -> vector<16x12xf32>
    %21 = vector.extract_strided_slice %1 {offsets = [0, 20], sizes = [1, 12], strides = [1, 1]} : vector<8x273xf32> to vector<1x12xf32>
    %22 = vector.broadcast %21 : vector<1x12xf32> to vector<16x12xf32>
    %23 = arith.addf %20, %22 : vector<16x12xf32>
    %24 = vector.extract_strided_slice %23 {offsets = [0, 0], sizes = [16, 4], strides = [1, 1]} : vector<16x12xf32> to vector<16x4xf32>
    %cst_9 = arith.constant 0.707106769 : f32
    %25 = vector.broadcast %cst_9 : f32 to vector<16x4xf32>
    %26 = arith.mulf %24, %25 : vector<16x4xf32>
    %27 = vector.extract_strided_slice %23 {offsets = [0, 4], sizes = [16, 8], strides = [1, 1]} : vector<16x12xf32> to vector<16x8xf32>
    %c8_i32 = arith.constant 8 : i32
    %28 = tpu.dynamic_rotate %27 by %c8_i32 dim 0 : vector<16x8xf32>, i32 -> vector<16x8xf32>
    %29 = vector.extract_strided_slice %27 {offsets = [0, 0], sizes = [16, 4], strides = [1, 1]} : vector<16x8xf32> to vector<16x4xf32>
    %30 = vector.extract_strided_slice %28 {offsets = [0, 0], sizes = [16, 4], strides = [1, 1]} : vector<16x8xf32> to vector<16x4xf32>
    %31 = tpu.concatenate %29, %30 in 1 : vector<16x4xf32>, vector<16x4xf32> -> vector<16x8xf32>
    %32 = vector.extract_strided_slice %27 {offsets = [0, 4], sizes = [16, 4], strides = [1, 1]} : vector<16x8xf32> to vector<16x4xf32>
    %33 = vector.extract_strided_slice %28 {offsets = [0, 4], sizes = [16, 4], strides = [1, 1]} : vector<16x8xf32> to vector<16x4xf32>
    %34 = tpu.concatenate %32, %33 in 1 : vector<16x4xf32>, vector<16x4xf32> -> vector<16x8xf32>
    %35 = tpu.concatenate %26, %26 in 1 : vector<16x4xf32>, vector<16x4xf32> -> vector<16x8xf32>
    %36 = arith.mulf %35, %31 : vector<16x8xf32>
    %37 = vector.extract_strided_slice %1 {offsets = [0, 241], sizes = [8, 4], strides = [1, 1]} : vector<8x273xf32> to vector<8x4xf32>
    %cst_10 = arith.constant dense<0.000000e+00> : vector<16x4xf32>
    %38 = tpu.matmul %36, %37, %cst_10 {dimension_numbers = #tpu.dot_dimension_numbers<[1], [0], [0], [1], [0, 0, 1, 1], [], []>} : vector<16x8xf32>, vector<8x4xf32>, vector<16x4xf32> -> vector<16x4xf32>
    %39 = vector.extract_strided_slice %38 {offsets = [0, 0], sizes = [16, 2], strides = [1, 1]} : vector<16x4xf32> to vector<16x2xf32>
    %40 = vector.extract_strided_slice %38 {offsets = [0, 2], sizes = [16, 2], strides = [1, 1]} : vector<16x4xf32> to vector<16x2xf32>
    %41 = arith.maximumf %39, %40 : vector<16x2xf32>
    %42 = arith.subf %39, %41 : vector<16x2xf32>
    %43 = math.exp %42 : vector<16x2xf32>
    %44 = arith.subf %40, %41 : vector<16x2xf32>
    %45 = math.exp %44 : vector<16x2xf32>
    %46 = arith.addf %43, %45 : vector<16x2xf32>
    %47 = tpu.reciprocal %46 {approx = true} : vector<16x2xf32> -> vector<16x2xf32>
    %48 = arith.mulf %43, %47 : vector<16x2xf32>
    %49 = arith.mulf %45, %47 : vector<16x2xf32>
    %50 = tpu.concatenate %48, %49 in 1 : vector<16x2xf32>, vector<16x2xf32> -> vector<16x4xf32>
    %51 = vector.extract_strided_slice %1 {offsets = [0, 245], sizes = [4, 8], strides = [1, 1]} : vector<8x273xf32> to vector<4x8xf32>
    %cst_11 = arith.constant dense<0.000000e+00> : vector<16x8xf32>
    %52 = tpu.matmul %50, %51, %cst_11 {dimension_numbers = #tpu.dot_dimension_numbers<[1], [0], [0], [1], [0, 0, 1, 1], [], []>} : vector<16x4xf32>, vector<4x8xf32>, vector<16x8xf32> -> vector<16x8xf32>
    %53 = arith.mulf %52, %34 : vector<16x8xf32>
    %54 = vector.extract_strided_slice %1 {offsets = [0, 253], sizes = [8, 4], strides = [1, 1]} : vector<8x273xf32> to vector<8x4xf32>
    %cst_12 = arith.constant dense<0.000000e+00> : vector<16x4xf32>
    %55 = tpu.matmul %53, %54, %cst_12 {dimension_numbers = #tpu.dot_dimension_numbers<[1], [0], [0], [1], [0, 0, 1, 1], [], []>} : vector<16x8xf32>, vector<8x4xf32>, vector<16x4xf32> -> vector<16x4xf32>
    %56 = vector.extract_strided_slice %1 {offsets = [0, 32], sizes = [4, 4], strides = [1, 1]} : vector<8x273xf32> to vector<4x4xf32>
    %cst_13 = arith.constant dense<0.000000e+00> : vector<16x4xf32>
    %57 = tpu.matmul %55, %56, %cst_13 {dimension_numbers = #tpu.dot_dimension_numbers<[1], [0], [0], [1], [0, 0, 1, 1], [], []>} : vector<16x4xf32>, vector<4x4xf32>, vector<16x4xf32> -> vector<16x4xf32>
    %58 = vector.extract_strided_slice %1 {offsets = [0, 36], sizes = [1, 4], strides = [1, 1]} : vector<8x273xf32> to vector<1x4xf32>
    %59 = vector.broadcast %58 : vector<1x4xf32> to vector<16x4xf32>
    %60 = arith.addf %57, %59 : vector<16x4xf32>
    %61 = arith.addf %18, %60 : vector<16x4xf32>
    %62 = vector.extract_strided_slice %1 {offsets = [0, 40], sizes = [1, 4], strides = [1, 1]} : vector<8x273xf32> to vector<1x4xf32>
    %63 = vector.extract_strided_slice %1 {offsets = [0, 44], sizes = [1, 4], strides = [1, 1]} : vector<8x273xf32> to vector<1x4xf32>
    %cst_14 = arith.constant dense<0.000000e+00> : vector<16xf32>
    %64 = vector.multi_reduction <add>, %61, %cst_14 [1] : vector<16x4xf32> to vector<16xf32>
    %65 = vector.shape_cast %64 : vector<16xf32> to vector<16x1xf32>
    %cst_15 = arith.constant 4.000000e+00 : f32
    %66 = vector.broadcast %cst_15 : f32 to vector<16x1xf32>
    %67 = arith.divf %65, %66 : vector<16x1xf32>
    %68 = vector.broadcast %67 : vector<16x1xf32> to vector<16x4xf32>
    %69 = arith.subf %61, %68 : vector<16x4xf32>
    %70 = arith.mulf %69, %69 : vector<16x4xf32>
    %cst_16 = arith.constant dense<0.000000e+00> : vector<16xf32>
    %71 = vector.multi_reduction <add>, %70, %cst_16 [1] : vector<16x4xf32> to vector<16xf32>
    %72 = vector.shape_cast %71 : vector<16xf32> to vector<16x1xf32>
    %cst_17 = arith.constant 4.000000e+00 : f32
    %73 = vector.broadcast %cst_17 : f32 to vector<16x1xf32>
    %74 = arith.divf %72, %73 : vector<16x1xf32>
    %75 = vector.broadcast %67 : vector<16x1xf32> to vector<16x4xf32>
    %76 = arith.subf %61, %75 : vector<16x4xf32>
    %cst_18 = arith.constant 9.99999974E-6 : f32
    %77 = vector.broadcast %cst_18 : f32 to vector<16x1xf32>
    %78 = arith.addf %74, %77 : vector<16x1xf32>
    %79 = math.rsqrt %78 : vector<16x1xf32>
    %80 = vector.broadcast %79 : vector<16x1xf32> to vector<16x4xf32>
    %81 = arith.mulf %76, %80 : vector<16x4xf32>
    %82 = vector.broadcast %62 : vector<1x4xf32> to vector<16x4xf32>
    %83 = arith.mulf %81, %82 : vector<16x4xf32>
    %84 = vector.broadcast %63 : vector<1x4xf32> to vector<16x4xf32>
    %85 = arith.addf %83, %84 : vector<16x4xf32>
    %86 = vector.extract_strided_slice %1 {offsets = [0, 48], sizes = [4, 8], strides = [1, 1]} : vector<8x273xf32> to vector<4x8xf32>
    %cst_19 = arith.constant dense<0.000000e+00> : vector<16x8xf32>
    %87 = tpu.matmul %85, %86, %cst_19 {dimension_numbers = #tpu.dot_dimension_numbers<[1], [0], [0], [1], [0, 0, 1, 1], [], []>} : vector<16x4xf32>, vector<4x8xf32>, vector<16x8xf32> -> vector<16x8xf32>
    %88 = vector.extract_strided_slice %1 {offsets = [0, 56], sizes = [1, 8], strides = [1, 1]} : vector<8x273xf32> to vector<1x8xf32>
    %89 = vector.broadcast %88 : vector<1x8xf32> to vector<16x8xf32>
    %90 = arith.addf %87, %89 : vector<16x8xf32>
    %cst_20 = arith.constant 0.000000e+00 : f32
    %91 = vector.broadcast %cst_20 : f32 to vector<16x8xf32>
    %92 = arith.maximumf %90, %91 : vector<16x8xf32>
    %93 = vector.extract_strided_slice %1 {offsets = [0, 64], sizes = [8, 4], strides = [1, 1]} : vector<8x273xf32> to vector<8x4xf32>
    %cst_21 = arith.constant dense<0.000000e+00> : vector<16x4xf32>
    %94 = tpu.matmul %92, %93, %cst_21 {dimension_numbers = #tpu.dot_dimension_numbers<[1], [0], [0], [1], [0, 0, 1, 1], [], []>} : vector<16x8xf32>, vector<8x4xf32>, vector<16x4xf32> -> vector<16x4xf32>
    %95 = vector.extract_strided_slice %1 {offsets = [0, 68], sizes = [1, 4], strides = [1, 1]} : vector<8x273xf32> to vector<1x4xf32>
    %96 = vector.broadcast %95 : vector<1x4xf32> to vector<16x4xf32>
    %97 = arith.addf %94, %96 : vector<16x4xf32>
    %98 = arith.addf %85, %97 : vector<16x4xf32>
    %99 = vector.extract_strided_slice %1 {offsets = [0, 72], sizes = [1, 4], strides = [1, 1]} : vector<8x273xf32> to vector<1x4xf32>
    %100 = vector.extract_strided_slice %1 {offsets = [0, 76], sizes = [1, 4], strides = [1, 1]} : vector<8x273xf32> to vector<1x4xf32>
    %cst_22 = arith.constant dense<0.000000e+00> : vector<16xf32>
    %101 = vector.multi_reduction <add>, %98, %cst_22 [1] : vector<16x4xf32> to vector<16xf32>
    %102 = vector.shape_cast %101 : vector<16xf32> to vector<16x1xf32>
    %cst_23 = arith.constant 4.000000e+00 : f32
    %103 = vector.broadcast %cst_23 : f32 to vector<16x1xf32>
    %104 = arith.divf %102, %103 : vector<16x1xf32>
    %105 = vector.broadcast %104 : vector<16x1xf32> to vector<16x4xf32>
    %106 = arith.subf %98, %105 : vector<16x4xf32>
    %107 = arith.mulf %106, %106 : vector<16x4xf32>
    %cst_24 = arith.constant dense<0.000000e+00> : vector<16xf32>
    %108 = vector.multi_reduction <add>, %107, %cst_24 [1] : vector<16x4xf32> to vector<16xf32>
    %109 = vector.shape_cast %108 : vector<16xf32> to vector<16x1xf32>
    %cst_25 = arith.constant 4.000000e+00 : f32
    %110 = vector.broadcast %cst_25 : f32 to vector<16x1xf32>
    %111 = arith.divf %109, %110 : vector<16x1xf32>
    %112 = vector.broadcast %104 : vector<16x1xf32> to vector<16x4xf32>
    %113 = arith.subf %98, %112 : vector<16x4xf32>
    %cst_26 = arith.constant 9.99999974E-6 : f32
    %114 = vector.broadcast %cst_26 : f32 to vector<16x1xf32>
    %115 = arith.addf %111, %114 : vector<16x1xf32>
    %116 = math.rsqrt %115 : vector<16x1xf32>
    %117 = vector.broadcast %116 : vector<16x1xf32> to vector<16x4xf32>
    %118 = arith.mulf %113, %117 : vector<16x4xf32>
    %119 = vector.broadcast %99 : vector<1x4xf32> to vector<16x4xf32>
    %120 = arith.mulf %118, %119 : vector<16x4xf32>
    %121 = vector.broadcast %100 : vector<1x4xf32> to vector<16x4xf32>
    %122 = arith.addf %120, %121 : vector<16x4xf32>
    %123 = vector.extract_strided_slice %1 {offsets = [0, 80], sizes = [4, 128], strides = [1, 1]} : vector<8x273xf32> to vector<4x128xf32>
    %cst_27 = arith.constant dense<0.000000e+00> : vector<16x128xf32>
    %124 = tpu.matmul %122, %123, %cst_27 {dimension_numbers = #tpu.dot_dimension_numbers<[1], [0], [0], [1], [0, 0, 1, 1], [], []>} : vector<16x4xf32>, vector<4x128xf32>, vector<16x128xf32> -> vector<16x128xf32>
    %125 = vector.extract_strided_slice %2 {offsets = [0, 17], sizes = [16, 128], strides = [1, 1]} : vector<16x145xf32> to vector<16x128xf32>
    %126 = arith.mulf %124, %125 : vector<16x128xf32>
    %127 = vector.extract_strided_slice %1 {offsets = [0, 257], sizes = [2, 16], strides = [1, 1]} : vector<8x273xf32> to vector<2x16xf32>
    %cst_28 = arith.constant dense<0.000000e+00> : vector<2x128xf32>
    %128 = tpu.matmul %127, %126, %cst_28 {dimension_numbers = #tpu.dot_dimension_numbers<[1], [0], [0], [1], [0, 0, 1, 1], [], []>} : vector<2x16xf32>, vector<16x128xf32>, vector<2x128xf32> -> vector<2x128xf32>
    %c64_i32 = arith.constant 64 : i32
    %129 = tpu.dynamic_rotate %128 by %c64_i32 dim 1 : vector<2x128xf32>, i32 -> vector<2x128xf32>
    %130 = arith.addf %128, %129 : vector<2x128xf32>
    %c32_i32 = arith.constant 32 : i32
    %131 = tpu.dynamic_rotate %130 by %c32_i32 dim 1 : vector<2x128xf32>, i32 -> vector<2x128xf32>
    %132 = arith.addf %130, %131 : vector<2x128xf32>
    %c16_i32 = arith.constant 16 : i32
    %133 = tpu.dynamic_rotate %132 by %c16_i32 dim 1 : vector<2x128xf32>, i32 -> vector<2x128xf32>
    %134 = arith.addf %132, %133 : vector<2x128xf32>
    %135 = vector.extract_strided_slice %134 {offsets = [0, 0], sizes = [2, 16], strides = [1, 1]} : vector<2x128xf32> to vector<2x16xf32>
    %136 = vector.extract_strided_slice %1 {offsets = [0, 208], sizes = [1, 16], strides = [1, 1]} : vector<8x273xf32> to vector<1x16xf32>
    %137 = vector.broadcast %136 : vector<1x16xf32> to vector<2x16xf32>
    %138 = arith.addf %135, %137 : vector<2x16xf32>
    %cst_29 = arith.constant 5.000000e-01 : f32
    %139 = vector.broadcast %cst_29 : f32 to vector<2x16xf32>
    %140 = arith.mulf %139, %138 : vector<2x16xf32>
    %cst_30 = arith.constant 0.707106769 : f32
    %141 = vector.broadcast %cst_30 : f32 to vector<2x16xf32>
    %142 = arith.mulf %138, %141 : vector<2x16xf32>
    %143 = math.erf %142 : vector<2x16xf32>
    %cst_31 = arith.constant 1.000000e+00 : f32
    %144 = vector.broadcast %cst_31 : f32 to vector<2x16xf32>
    %145 = arith.addf %144, %143 : vector<2x16xf32>
    %146 = arith.mulf %140, %145 : vector<2x16xf32>
    %147 = vector.extract_strided_slice %2 {offsets = [0, 0], sizes = [16, 16], strides = [1, 1]} : vector<16x145xf32> to vector<16x16xf32>
    %cst_32 = arith.constant dense<0.000000e+00> : vector<2x16xf32>
    %148 = tpu.matmul %146, %147, %cst_32 {dimension_numbers = #tpu.dot_dimension_numbers<[1], [0], [0], [1], [0, 0, 1, 1], [], []>} : vector<2x16xf32>, vector<16x16xf32>, vector<2x16xf32> -> vector<2x16xf32>
    %149 = vector.extract_strided_slice %1 {offsets = [0, 224], sizes = [1, 16], strides = [1, 1]} : vector<8x273xf32> to vector<1x16xf32>
    %150 = vector.broadcast %149 : vector<1x16xf32> to vector<2x16xf32>
    %151 = arith.addf %148, %150 : vector<2x16xf32>
    %cst_33 = arith.constant 5.000000e-01 : f32
    %152 = vector.broadcast %cst_33 : f32 to vector<2x16xf32>
    %153 = arith.mulf %152, %151 : vector<2x16xf32>
    %cst_34 = arith.constant 0.707106769 : f32
    %154 = vector.broadcast %cst_34 : f32 to vector<2x16xf32>
    %155 = arith.mulf %151, %154 : vector<2x16xf32>
    %156 = math.erf %155 : vector<2x16xf32>
    %cst_35 = arith.constant 1.000000e+00 : f32
    %157 = vector.broadcast %cst_35 : f32 to vector<2x16xf32>
    %158 = arith.addf %157, %156 : vector<2x16xf32>
    %159 = arith.mulf %153, %158 : vector<2x16xf32>
    %160 = vector.extract_strided_slice %2 {offsets = [0, 16], sizes = [16, 1], strides = [1, 1]} : vector<16x145xf32> to vector<16x1xf32>
    %cst_36 = arith.constant dense<0.000000e+00> : vector<2x1xf32>
    %161 = tpu.matmul %159, %160, %cst_36 {dimension_numbers = #tpu.dot_dimension_numbers<[1], [0], [0], [1], [0, 0, 1, 1], [], []>} : vector<2x16xf32>, vector<16x1xf32>, vector<2x1xf32> -> vector<2x1xf32>
    %162 = vector.extract_strided_slice %1 {offsets = [0, 240], sizes = [1, 1], strides = [1, 1]} : vector<8x273xf32> to vector<1x1xf32>
    %163 = vector.broadcast %162 : vector<1x1xf32> to vector<2x1xf32>
    %164 = arith.addf %161, %163 : vector<2x1xf32>
    %cst_37 = arith.constant 0.000000e+00 : f32
    %165 = vector.broadcast %cst_37 : f32 to vector<2x1xf32>
    %166 = arith.minimumf %164, %165 : vector<2x1xf32>
    %c0_38 = arith.constant 0 : index
    %c0_39 = arith.constant 0 : index
    %167 = vector.load %arg3[%c0_38, %c0_39] : memref<2x1xf32, #tpu.memory_space<vmem>>, vector<2x1xf32>
    tpu.vector_store %arg3[%c0_38, %c0_39], %166 {strides = array<i32>} : memref<2x1xf32, #tpu.memory_space<vmem>>, vector<2x1xf32>,
    return
  }
}

</mosaic_0001>

<bundles_post_ra>
// kernel: tpu_custom_call.1
= control target key start
LH: loop header
LB: loop body
LE: loop exit
PB: predicated region body
PF: predicated region fallthrough
CT: control target
= control target key end

     0   :  { %8 = vsyncpa [#allocation3], 0  ;;  %s1319_s0 = inlined_call_operand.hbm [shape: f32[16,10], index: 0, kind: input, shape index: {}]   ;;  %s1320_s1 = inlined_call_operand.hbm [shape: f32[8,273], index: 1, kind: input, shape index: {}]   ;;  %s1321_s2 = inlined_call_operand.hbm [shape: f32[16,145], index: 2, kind: input, shape index: {}]   ;;  %s1322_s3 = inlined_call_operand.vmem [shape: f32[2,1], index: 3, kind: output, shape index: {}]  }
   0x1   :  { %9 = vsyncpa [#allocation5], 0  ;;  %s28_s14 = sshll.u32 %s1320_s1, 4  ;;  %s1101_s15 = smov [#allocation4]   ;;  %s29_s14 = int_to_ptr.hbm [resolvable:$true] %s28_s14 }
   0x2   :  { %s30_s16 = sshll.u32 %s1101_s15, 4  ;;  %s14_s19 = sshll.u32 %s1319_s0, 4  ;;  %s31_s16 = int_to_ptr.vmem [resolvable:$true] %s30_s16  ;;  %s15_s19 = int_to_ptr.hbm [resolvable:$true] %s14_s19 }
   0x3   :  { %33 = dma.hbm_to_vmem [thread:$0]  %s29_s14, 384, %s31_s16, [#allocation5]  }
   0x4   :  { %s1102_s20 = smov [#allocation2]   ;;  %s1103_s22 = smov 128  }
   0x5   :  { %s16_s21 = sshll.u32 %s1102_s20, 4  ;;  %s1104_s23 = smov 8   ;;  %s17_s21 = int_to_ptr.vmem [resolvable:$true] %s16_s21 }
   0x6   :  { %22 = dma.hbm_to_vmem [thread:$0]  %s15_s19, 256, %s17_s21, [#allocation3], %s1103_s22, %s1103_s22, %s1104_s23  }
   0x7   :  { %s38_s1 = sshll.u32 %s1321_s2, 4  ;;  %s1105_s26 = smov [#allocation6]   ;;  %s39_s1 = int_to_ptr.hbm [resolvable:$true] %s38_s1 }
   0x8   :  { %s40_s27 = sshll.u32 %s1105_s26, 4  ;;  %s1106_s28 = smov 256   ;;  %s41_s27 = int_to_ptr.vmem [resolvable:$true] %s40_s27 }
   0x9   :  { %s1107_s29 = smov 16  }
   0xa   :  { %46 = dma.hbm_to_vmem [thread:$0]  %s39_s1, 512, %s41_s27, [#allocation5], %s1106_s28, %s1106_s28, %s1107_s29  }
   0xb   :  { %1097 = dma.done.wait [#allocation3], 256  }
   0xc   :  { %1098 = vsyncadd [#allocation3], 4294967040 }
   0xd   :  { %1099 = dma.done.wait [#allocation5], 896  }
   0xe   :  { %1100 = vsyncadd [#allocation5], 4294966400  ;;  %vm80_vm0 = vcmask 1045504   ;;  %vm73_vm1 = vcmask 48128   ;;  %v1164_v0 = vld [vmem:[#allocation4] sm:$0xff]  ;;  %v59_v1 = vld [vmem:[#allocation2] sm:$0xff] }
   0xf   :  { %v1167_v2 = vperm.slane %v1164_v0, 0  ;;  %921 = vmatpush.msk.msra.mxu0 %vm80_vm0, %v1164_v0  ;;  %s1108_s0 = smov 120   ;;  %s1109_s2 = smov 124   ;;  %v60_v3 = vld [vmem:[#allocation2 + $0x8] sm:$0xff]  ;;  %vm215_vm2 = vcmask 1043456   ;;  %vm208_vm10 = vcmask 31744  }
  0x10   :  { %203 = vrot.lane.b32.xlu1 %v1164_v0, %s1108_s0  ;;  %922 = vmatmul.msk.f32.vlgmr.msra.gmra.mxu0 %vm73_vm1, %v59_v1  ;;  %s1110_s30 = smov 122   ;;  %s1111_s4 = smov 108   ;;  %vm283_vm12 = vcmask 64512   ;;  %vm367_vm13 = vcmask 15360   ;;  %vm410_vm14 = vcmask 23552  }
  0x11   :  { %70 = vrot.lane.b32.xlu0 %v1167_v2, %s1109_s2  ;;  %205 = vrot.lane.b32.xlu2 %v1167_v2, %s1111_s4  ;;  %s1112_s5 = smov 4   ;;  %s1113_s6 = smov 15  }
  0x12   :  { %s1114_s7 = smov 126   ;;  %s1115_s8 = smov 2  }
  0x13   :  { %s1116_s9 = smov 11   ;;  %s1117_s10 = smov 3  }
  0x14   :  { %s1118_s11 = smov 96   ;;  %s1119_s12 = smov 92  }
  0x15   :  { %s1120_s13 = smov 84   ;;  %s1122_s14 = smov 80  }
  0x16   :  { %s1123_s15 = smov 72   ;;  %s1124_s16 = smov 88  }
  0x17   :  { %s1125_s17 = smov 64   ;;  %s1126_s18 = smov 60  }
  0x18   :  { %197 = vrot.lane.b32.xlu1 %v60_v3, %s1110_s30  ;;  %923 = vmatmul.msk.f32.gmra.mxu0 %vm73_vm1, %v60_v3  ;;  %s1127_s19 = smov 56   ;;  %s1128_s20 = smov 48  }
  0x19   :  { %195 = vrot.lane.b32.xlu0 %v59_v1, %s1110_s30  ;;  %s1129_s21 = smov 52   ;;  %s1130_s22 = smov 111  }
  0x1a   :  { %s1131_s23 = smov 127   ;;  %s1132_s24 = smov 32  }
  0x1b   :  { %s1133_s25 = smov 112  }
  0x82   :  { %v204_v28 = vpop.permute.xlu1 %203 }
  0x83   :  { %v71_v4 = vpop.permute.xlu0 %70  ;;  %926 = vmatpush.msk.msra.mxu1 %vm215_vm2, %v204_v28 }
  0x8d   :  { %v101_v5 = vpop.f32.mrf.mxu0 }
  0x8e   :  { %v1175_v6 = vadd.f32 %v101_v5, %v71_v4 }
  0x90   :  { %v1178_v7 = vmul.f32 0.70710677, %v1175_v6 }
  0x92   :  { %v111_v8 = vmul.f32 %v1178_v7, %v1178_v7 }
  0x94   :  { %v112_v9 = vmin.f32 %v111_v8, 16.0 }
  0x95   :  { %v104_v10 = vpop.f32.mrf.mxu0 }
  0x96   :  { %v113_v11 = vmul.f32 2.1237322e-06, %v112_v9  ;;  %v1182_v12 = vadd.f32 %v104_v10, %v71_v4  ;;  %v124_v13 = vmul.f32 3.8918573e-05, %v112_v9 }
  0x98   :  { %v114_v14 = vadd.f32 0.00028619796, %v113_v11  ;;  %v1185_v15 = vmul.f32 0.70710677, %v1182_v12  ;;  %v125_v16 = vadd.f32 0.001143296, %v124_v13 }
  0x9a   :  { %v115_v17 = vmul.f32 %v114_v14, %v112_v9  ;;  %v151_v18 = vmul.f32 %v1185_v15, %v1185_v15  ;;  %v126_v19 = vmul.f32 %v125_v16, %v112_v9 }
  0x9c   :  { %v152_v20 = vmin.f32 %v151_v18, 16.0  ;;  %v127_v21 = vadd.f32 0.014752088, %v126_v19  ;;  %v116_v22 = vadd.f32 0.0036580483, %v115_v17  ;;  %v107_v17 = vmul.f32 0.5, %v1175_v6  ;;  %v196_v19 = vpop.permute.xlu0 %195 }
  0x9e   :  { %v153_v23 = vmul.f32 2.1237322e-06, %v152_v20  ;;  %v164_v24 = vmul.f32 3.8918573e-05, %v152_v20  ;;  %v128_v25 = vmul.f32 %v127_v21, %v112_v9  ;;  %v117_v30 = vmul.f32 %v116_v22, %v112_v9 }
  0xa0   :  { %v154_v26 = vadd.f32 0.00028619796, %v153_v23  ;;  %v165_v27 = vadd.f32 0.001143296, %v164_v24  ;;  %v129_v29 = vadd.f32 0.112945676, %v128_v25 }
  0xa1   :  { %v118_v36 = vadd.f32 0.05243302, %v117_v30 }
  0xa2   :  { %v166_v31 = vmul.f32 %v165_v27, %v152_v20  ;;  %v155_v32 = vmul.f32 %v154_v26, %v152_v20  ;;  %v130_v33 = vmul.f32 %v129_v29, %v112_v9  ;;  %v108_v27 = vmul.f32 0.5, %v1182_v12  ;;  %v198_v29 = vpop.permute.xlu1 %197 }
  0xa3   :  { %v119_v42 = vmul.f32 %v118_v36, %v112_v9 }
  0xa4   :  { %v131_v34 = vadd.f32 0.4994258, %v130_v33  ;;  %v167_v35 = vadd.f32 0.014752088, %v166_v31  ;;  %v156_v37 = vadd.f32 0.0036580483, %v155_v32 }
  0xa5   :  { %v120_v45 = vadd.f32 0.18741608, %v119_v42 }
  0xa6   :  { %v132_v38 = vmul.f32 %v131_v34, %v112_v9  ;;  %v168_v39 = vmul.f32 %v167_v35, %v152_v20  ;;  %v157_v43 = vmul.f32 %v156_v37, %v152_v20  ;;  %v1212_v37 = vld [vmem:[#allocation4 + $0x8] sm:$0xff] }
  0xa7   :  { %v121_v50 = vmul.f32 %v120_v45, %v112_v9 }
  0xa8   :  { %v133_v40 = vadd.f32 1.0, %v132_v38  ;;  %v169_v41 = vadd.f32 0.112945676, %v168_v39  ;;  %v158_v47 = vadd.f32 0.05243302, %v157_v43 }
  0xa9   :  { %v122_v56 = vadd.f32 1.1283791, %v121_v50 }
  0xaa   :  { %995 = vrcp.f32 %v133_v40  ;;  %v170_v44 = vmul.f32 %v169_v41, %v152_v20  ;;  %v159_v53 = vmul.f32 %v158_v47, %v152_v20  ;;  %v145_v55 = vand.u32 2147483648, %v133_v40 }
  0xab   :  { %v143_v58 = vand.u32 2147483647, %v133_v40  ;;  %vm139_vm4 = vweird.f32 %v133_v40  ;;  %v123_v63 = vmul.f32 %v122_v56, %v1178_v7 }
  0xac   :  { %v171_v46 = vadd.f32 0.4994258, %v170_v44  ;;  %v160_v59 = vadd.f32 0.18741608, %v159_v53  ;;  %v146_v61 = vor.u32 1.1754944e-38, %v145_v55 }
  0xad   :  { %vm144_vm6 = vcmp.eq.f32.partialorder %v143_v58, 8.507059e+37 }
  0xae   :  { %v172_v48 = vmul.f32 %v171_v46, %v152_v20  ;;  %v161_v3 = vmul.f32 %v160_v59, %v152_v20 }
  0xb0   :  { %v996_v49 = vpop.eup %995  ;;  %v173_v52 = vadd.f32 1.0, %v172_v48  ;;  %v162_v13 = vadd.f32 1.1283791, %v161_v3 }
  0xb1   :  { %v135_v51 = vmul.f32 %v996_v49, %v133_v40  ;;  %vm140_vm3 = vweird.f32 %v996_v49 }
  0xb2   :  { %997 = vrcp.f32 %v173_v52  ;;  %vm141_vm5 = vmor %vm139_vm4, %vm140_vm3  ;;  %v185_v11 = vand.u32 2147483648, %v173_v52  ;;  %v183_v16 = vand.u32 2147483647, %v173_v52  ;;  %vm179_vm8 = vweird.f32 %v173_v52 }
  0xb3   :  { %v136_v54 = vsub.f32 1.0, %v135_v51  ;;  %v163_v20 = vmul.f32 %v162_v13, %v1185_v15  ;;  %v206_v15 = vpop.permute.xlu2 %205 }
  0xb4   :  { %v186_v22 = vor.u32 1.1754944e-38, %v185_v11  ;;  %vm184_vm11 = vcmp.eq.f32.partialorder %v183_v16, 8.507059e+37 }
  0xb5   :  { %v137_v57 = vmul.f32 %v996_v49, %v136_v54 }
  0xb7   :  { %v138_v60 = vadd.f32 %v996_v49, %v137_v57 }
  0xb8   :  { %v998_v62 = vpop.eup %997 }
  0xb9   :  { %v142_v1 = vsel %vm141_vm5, %v996_v49, %v138_v60  ;;  %v175_v5 = vmul.f32 %v998_v62, %v173_v52  ;;  %vm180_vm7 = vweird.f32 %v998_v62 }
  0xba   :  { %v147_v4 = vsel %vm144_vm6, %v146_v61, %v142_v1  ;;  %vm181_vm9 = vmor %vm179_vm8, %vm180_vm7 }
  0xbb   :  { %v148_v8 = vmul.f32 %v147_v4, %v123_v63  ;;  %v176_v9 = vsub.f32 1.0, %v175_v5 }
  0xbd   :  { %v924_v10 = vclamps-f32 %v148_v8, 1.0  ;;  %v177_v14 = vmul.f32 %v998_v62, %v176_v9 }
  0xbf   :  { %v191_v18 = vadd.f32 1.0, %v924_v10  ;;  %v178_v21 = vadd.f32 %v998_v62, %v177_v14 }
  0xc1   :  { %v193_v7 = vmul.f32 %v191_v18, %v107_v17  ;;  %v182_v23 = vsel %vm181_vm9, %v998_v62, %v178_v21 }
  0xc2   :  { %v187_v25 = vsel %vm184_vm11, %v186_v22, %v182_v23  ;;  %v1239_v22 = vld [vmem:[#allocation4 + $0x10] sm:$0xff]  ;;  %vm674_vm11 = vcmask 392192  }
  0xc3   :  { %v1193_v24 = vadd.f32 %v196_v19, %v193_v7  ;;  %v188_v26 = vmul.f32 %v187_v25, %v163_v20  ;;  %v985_v20 = vpack.i.bf16 %v1239_v22, %v1212_v37 }
  0xc5   :  { %927 = vmatmul.msk.f32.vlgmr.msra.gmra.mxu1 %vm208_vm10, %v1193_v24  ;;  %v925_v6 = vclamps-f32 %v188_v26, 1.0 }
  0xc7   :  { %v192_v28 = vadd.f32 1.0, %v925_v6 }
  0xc9   :  { %v194_v30 = vmul.f32 %v192_v28, %v108_v27 }
  0xcb   :  { %v1198_v31 = vadd.f32 %v198_v29, %v194_v30 }
  0xcd   :  { %928 = vmatmul.msk.f32.gmra.mxu1 %vm208_vm10, %v1198_v31 }
 0x142   :  { %v235_v32 = vpop.f32.mrf.mxu1 }
 0x143   :  { %v1202_v33 = vadd.f32 %v235_v32, %v206_v15 }
 0x145   :  { %245 = vrot.lane.b32.xlu0 %v1202_v33, %s1109_s2  ;;  %v241_v12 = vmul.f32 0.70710677, %v1202_v33 }
 0x14a   :  { %v238_v34 = vpop.f32.mrf.mxu1 }
 0x14b   :  { %v1206_v35 = vadd.f32 %v238_v34, %v206_v15 }
 0x14d   :  { %247 = vrot.lane.b32.xlu2 %v1206_v35, %s1109_s2  ;;  %v242_v36 = vmul.f32 0.70710677, %v1206_v35  ;;  %280 = vrot.lane.b32.xlu0 %v1212_v37, %s1113_s6 }
 0x155   :  { %269 = vrot.lane.b32.xlu2 %v241_v12, %s1112_s5 }
 0x15d   :  { %271 = vrot.lane.b32.xlu2 %v242_v36, %s1112_s5 }
 0x1a7   :  { %v1215_v38 = vpop.permute.xlu2 %247 }
 0x1a8   :  { %251 = vrot.lane.b32.xlu1 %v1215_v38, %s1112_s5 }
 0x1af   :  { %v270_v41 = vpop.permute.xlu2 %269 }
 0x1b0   :  { %v275_v43 = vsel %vm208_vm10, %v241_v12, %v270_v41 }
 0x1b7   :  { %v1218_v39 = vpop.permute.xlu0 %245  ;;  %v272_v46 = vpop.permute.xlu2 %271 }
 0x1b8   :  { %253 = vrot.lane.b32.xlu1 %v1218_v39, %s1112_s5  ;;  %v276_v48 = vsel %vm208_vm10, %v242_v36, %v272_v46 }
 0x1bf   :  { %v281_v40 = vpop.permute.xlu0 %280 }
 0x1c0   :  { %305 = vmatpush.msra.mxu2 %v281_v40 }
 0x21a   :  { %v252_v42 = vpop.permute.xlu1 %251 }
 0x21b   :  { %v257_v44 = vsel %vm208_vm10, %v1218_v39, %v252_v42 }
 0x21c   :  { %v277_v45 = vmul.f32 %v275_v43, %v257_v44 }
 0x21e   :  { %929 = vmatmul.msk.f32.vlgmr.msra.gmra.mxu2 %vm283_vm12, %v277_v45 }
 0x22a   :  { %v254_v47 = vpop.permute.xlu1 %253 }
 0x22b   :  { %v258_v49 = vsel %vm208_vm10, %v1215_v38, %v254_v47 }
 0x22c   :  { %v278_v50 = vmul.f32 %v276_v48, %v258_v49 }
 0x22e   :  { %930 = vmatmul.msk.f32.gmra.mxu2 %vm283_vm12, %v278_v50 }
 0x2a1   :  { %v307_v51 = vpop.f32.mrf.mxu2 }
 0x2a2   :  { %315 = vrot.lane.b32.xlu0 %v307_v51, %s1114_s7 }
 0x2b1   :  { %v310_v52 = vpop.f32.mrf.mxu2 }
 0x2b2   :  { %317 = vrot.lane.b32.xlu1 %v310_v52, %s1114_s7 }
 0x314   :  { %v316_v53 = vpop.permute.xlu0 %315 }
 0x315   :  { %v321_v54 = vmax.f32 %v307_v51, %v316_v53  ;;  %v1121_v53 = vmov 4.0  }
 0x317   :  { %331 = vrot.lane.b32.xlu2 %v321_v54, %s1115_s8  ;;  %v323_v3 = vsub.f32 %v307_v51, %v321_v54 }
 0x319   :  { %v325_v4 = vmul.f32 1.442695, %v323_v3 }
 0x324   :  { %v318_v55 = vpop.permute.xlu1 %317 }
 0x325   :  { %v322_v56 = vmax.f32 %v310_v52, %v318_v55 }
 0x327   :  { %333 = vrot.lane.b32.xlu0 %v322_v56, %s1115_s8  ;;  %v324_v9 = vsub.f32 %v310_v52, %v322_v56 }
 0x329   :  { %v327_v11 = vmul.f32 1.442695, %v324_v9 }
 0x371   :  { %v332_v57 = vpop.permute.xlu2 %331 }
 0x372   :  { %v337_v58 = vsub.f32 %v307_v51, %v332_v57 }
 0x374   :  { %v339_v59 = vmul.f32 1.442695, %v337_v58 }
 0x376   :  { %999 = vpow2.f32 %v339_v59 }
 0x37c   :  { %v1000_v60 = vpop.eup %999 }
 0x37d   :  { %345 = vrot.lane.b32.xlu1 %v1000_v60, %s1114_s7 }
 0x385   :  { %370 = vrot.lane.b32.xlu1 %v1212_v37, %s1116_s9 }
 0x38d   :  { %986 = vrot.lane.b32.xlu1 %v985_v20, %s1117_s10 }
 0x395   :  { %444 = vrot.lane.b32.xlu1 %v1167_v2, %s1119_s12 }
 0x399   :  { %v334_v61 = vpop.permute.xlu0 %333 }
 0x39a   :  { %v338_v62 = vsub.f32 %v310_v52, %v334_v61 }
 0x39c   :  { %v341_v63 = vmul.f32 1.442695, %v338_v62 }
 0x39e   :  { %1001 = vpow2.f32 %v341_v63 }
 0x39f   :  { %1003 = vpow2.f32 %v325_v4 }
 0x3a4   :  { %v1002_v1 = vpop.eup %1001 }
 0x3a5   :  { %347 = vrot.lane.b32.xlu2 %v1002_v1, %s1114_s7  ;;  %v1004_v5 = vpop.eup %1003 }
 0x3ef   :  { %v346_v8 = vpop.permute.xlu1 %345 }
 0x3f0   :  { %v351_v10 = vadd.f32 %v1004_v5, %v346_v8 }
 0x3f2   :  { %1005 = vrcp.f32 %v351_v10 }
 0x3f3   :  { %1007 = vpow2.f32 %v327_v11 }
 0x3f7   :  { %v371_v7 = vpop.permute.xlu1 %370 }
 0x3f8   :  { %v1006_v13 = vpop.eup %1005  ;;  %931 = vmatpush.msk.msra.mxu3 %vm215_vm2, %v371_v7 }
 0x3f9   :  { %359 = vrot.lane.b32.xlu0 %v1006_v13, %s1115_s8  ;;  %v355_v14 = vmul.f32 %v1006_v13, %v1004_v5  ;;  %v1008_v16 = vpop.eup %1007 }
 0x3ff   :  { %v348_v17 = vpop.permute.xlu2 %347  ;;  %v987_v29 = vpop.permute.xlu1 %986 }
 0x400   :  { %v352_v18 = vadd.f32 %v1008_v16, %v348_v17  ;;  %v989_v30 = vunpack.i.h.bf16 %v987_v29  ;;  %v988_v15 = vunpack.i.l.bf16 %v987_v29 }
 0x401   :  { %259 = vrot.lane.b32.xlu0 %v1202_v33, %s1108_s0 }
 0x402   :  { %1009 = vrcp.f32 %v352_v18  ;;  %v411_v32 = vsel %vm410_vm14, %v988_v15, %v989_v30 }
 0x403   :  { %434 = vmatpush.msrb.mxu0 %v411_v32  ;;  %1011 = vrcp.f32 %v1121_v53 }
 0x408   :  { %v1010_v19 = vpop.eup %1009 }
 0x409   :  { %361 = vrot.lane.b32.xlu2 %v1010_v19, %s1115_s8  ;;  %v356_v21 = vmul.f32 %v1010_v19, %v1008_v16  ;;  %442 = vrot.lane.b32.xlu0 %v1164_v0, %s1118_s11  ;;  %v1012_v54 = vpop.eup %1011 }
 0x40a   :  { %v487_v55 = vmul.f32 4.0, %v1012_v54  ;;  %vm491_vm15 = vweird.f32 %v1012_v54 }
 0x40c   :  { %v488_v56 = vsub.f32 1.0, %v487_v55 }
 0x40e   :  { %v489_v57 = vmul.f32 %v1012_v54, %v488_v56 }
 0x411   :  { %261 = vrot.lane.b32.xlu2 %v1206_v35, %s1108_s0 }
 0x463   :  { %v362_v6 = vpop.permute.xlu2 %361 }
 0x464   :  { %v366_v27 = vmul.f32 %v1002_v1, %v362_v6 }
 0x466   :  { %v369_v28 = vsel %vm367_vm13, %v356_v21, %v366_v27 }
 0x46b   :  { %v360_v23 = vpop.permute.xlu0 %359  ;;  %v262_v40 = vpop.permute.xlu2 %261 }
 0x46c   :  { %v365_v25 = vmul.f32 %v1000_v60, %v360_v23  ;;  %v266_v41 = vsel %vm208_vm10, %v262_v40, %v1218_v39 }
 0x46e   :  { %v368_v26 = vsel %vm367_vm13, %v355_v14, %v365_v25 }
 0x46f   :  { %932 = vmatmul.msk.f32.vlgmr.msra.gmra.mxu3 %vm208_vm10, %v368_v26 }
 0x473   :  { %v260_v33 = vpop.permute.xlu0 %259 }
 0x474   :  { %v265_v35 = vsel %vm208_vm10, %v260_v33, %v1215_v38  ;;  %v445_v38 = vpop.permute.xlu1 %444 }
 0x477   :  { %933 = vmatmul.msk.f32.gmra.mxu3 %vm208_vm10, %v369_v28 }
 0x47b   :  { %v443_v34 = vpop.permute.xlu0 %442 }
 0x47c   :  { %936 = vmatpush.msk.msrb.mxu1 %vm215_vm2, %v443_v34 }
 0x4f2   :  { %v397_v12 = vpop.f32.mrf.mxu3 }
 0x4f3   :  { %v403_v36 = vmul.f32 %v397_v12, %v265_v35 }
 0x4f5   :  { %934 = vmatmul.msk.f32.vlgmr.msrb.gmra.mxu0 %vm283_vm12, %v403_v36 }
 0x4fa   :  { %v400_v42 = vpop.f32.mrf.mxu3 }
 0x4fb   :  { %v404_v43 = vmul.f32 %v400_v42, %v266_v41 }
 0x4fd   :  { %935 = vmatmul.msk.f32.gmra.mxu0 %vm283_vm12, %v404_v43 }
 0x572   :  { %v436_v44 = vpop.f32.mrf.mxu0 }
 0x573   :  { %937 = vmatmul.msk.f32.vlgmr.msrb.gmra.mxu1 %vm208_vm10, %v436_v44 }
 0x57a   :  { %v439_v45 = vpop.f32.mrf.mxu0 }
 0x57b   :  { %938 = vmatmul.msk.f32.gmra.mxu1 %vm208_vm10, %v439_v45 }
 0x5f0   :  { %v472_v46 = vpop.f32.mrf.mxu1 }
 0x5f1   :  { %v473_v47 = vadd.f32 %v472_v46, %v445_v38 }
 0x5f3   :  { %v478_v48 = vadd.f32 %v473_v47, %v1193_v24  ;;  %v490_v24 = vadd.f32 %v1012_v54, %v489_v57 }
 0x5f5   :  { %v480_v39 = vsel %vm208_vm10, %v478_v48, 0.0  ;;  %v1261_v58 = vsel %vm491_vm15, %v1012_v54, %v490_v24  ;;  %vm719_vm15 = vcmask 908288  }
 0x5f6   :  { %481 = vadd.xlane.f32.xlu2 %v480_v39 }
 0x5f8   :  { %v475_v49 = vpop.f32.mrf.mxu1 }
 0x5f9   :  { %v476_v50 = vadd.f32 %v475_v49, %v445_v38 }
 0x5fb   :  { %v479_v51 = vadd.f32 %v476_v50, %v1198_v31 }
 0x5fd   :  { %v483_v52 = vsel %vm208_vm10, %v479_v51, 0.0 }
 0x5fe   :  { %484 = vadd.xlane.f32.xlu0 %v483_v52 }
 0x612   :  { %536 = vrot.lane.b32.xlu0 %v1167_v2, %s1120_s13 }
 0x61a   :  { %543 = vrot.lane.b32.xlu0 %v1167_v2, %s1123_s15 }
 0x669   :  { %v482_v59 = vpop.xlane.xlu2 %481 }
 0x66a   :  { %v493_v60 = vmul.f32 %v1261_v58, %v482_v59 }
 0x66c   :  { %v495_v31 = vsub.f32 %v478_v48, %v493_v60 }
 0x66e   :  { %v497_v61 = vmul.f32 %v495_v31, %v495_v31 }
 0x670   :  { %v499_v62 = vsel %vm208_vm10, %v497_v61, 0.0 }
 0x671   :  { %500 = vadd.xlane.f32.xlu1 %v499_v62  ;;  %v485_v63 = vpop.xlane.xlu0 %484 }
 0x672   :  { %v494_v1 = vmul.f32 %v1261_v58, %v485_v63 }
 0x674   :  { %v496_v3 = vsub.f32 %v479_v51, %v494_v1 }
 0x676   :  { %v498_v4 = vmul.f32 %v496_v3, %v496_v3 }
 0x678   :  { %v502_v5 = vsel %vm208_vm10, %v498_v4, 0.0  ;;  %v1292_v4 = vld [vmem:[#allocation6 + $0x10] sm:$0xff] }
 0x679   :  { %503 = vadd.xlane.f32.xlu2 %v502_v5 }
 0x684   :  { %v537_v29 = vpop.permute.xlu0 %536 }
 0x68a   :  { %541 = vrot.lane.b32.xlu1 %v1164_v0, %s1122_s14 }
 0x68c   :  { %v544_v42 = vpop.permute.xlu0 %543 }
 0x691   :  { %531 = vrot.lane.b32.xlu2 %v1167_v2, %s1124_s16 }
 0x692   :  { %582 = vrot.lane.b32.xlu1 %v1167_v2, %s1126_s18 }
 0x699   :  { %579 = vrot.lane.b32.xlu2 %v1164_v0, %s1125_s17 }
 0x6e4   :  { %v501_v8 = vpop.xlane.xlu1 %500 }
 0x6e5   :  { %v505_v9 = vmul.f32 %v501_v8, %v1261_v58 }
 0x6e7   :  { %v507_v10 = vadd.f32 1e-05, %v505_v9  ;;  %v65_v9 = vld [vmem:[#allocation6 + $0x8] sm:$0xff] }
 0x6e9   :  { %1013 = vrsqrt.f32 %v507_v10  ;;  %vm515_vm1 = vweird.f32 %v507_v10 }
 0x6ec   :  { %v504_v11 = vpop.xlane.xlu2 %503 }
 0x6ed   :  { %v506_v13 = vmul.f32 %v504_v11, %v1261_v58  ;;  %v1297_v11 = vld [vmem:[#allocation6] sm:$0xff] }
 0x6ef   :  { %v1014_v14 = vpop.eup %1013  ;;  %v508_v16 = vadd.f32 1e-05, %v506_v13 }
 0x6f0   :  { %v510_v17 = vmul.f32 %v1014_v14, %v507_v10  ;;  %vm516_vm0 = vweird.f32 %v1014_v14  ;;  %v67_v10 = vld [vmem:[#allocation6 + $0x18] sm:$0xff] }
 0x6f1   :  { %1015 = vrsqrt.f32 %v508_v16  ;;  %vm517_vm3 = vmor %vm515_vm1, %vm516_vm0  ;;  %vm525_vm5 = vweird.f32 %v508_v16 }
 0x6f2   :  { %v511_v18 = vmul.f32 %v1014_v14, %v510_v17 }
 0x6f4   :  { %v512_v19 = vmul.f32 0.5, %v511_v18  ;;  %v532_v6 = vpop.permute.xlu2 %531 }
 0x6f6   :  { %v513_v21 = vsub.f32 1.5, %v512_v19 }
 0x6f7   :  { %v1016_v7 = vpop.eup %1015 }
 0x6f8   :  { %v520_v20 = vmul.f32 %v1016_v7, %v508_v16  ;;  %v514_v23 = vmul.f32 %v1014_v14, %v513_v21  ;;  %vm526_vm4 = vweird.f32 %v1016_v7 }
 0x6f9   :  { %vm527_vm6 = vmor %vm525_vm5, %vm526_vm4 }
 0x6fa   :  { %v521_v25 = vmul.f32 %v1016_v7, %v520_v20  ;;  %v518_v26 = vsel %vm517_vm3, %v1014_v14, %v514_v23 }
 0x6fb   :  { %v529_v27 = vmul.f32 %v518_v26, %v495_v31 }
 0x6fc   :  { %v522_v28 = vmul.f32 0.5, %v521_v25  ;;  %v542_v30 = vpop.permute.xlu1 %541  ;;  %v580_v41 = vpop.permute.xlu2 %579 }
 0x6fd   :  { %v534_v15 = vmul.f32 %v532_v6, %v529_v27  ;;  %939 = vmatpush.msk.msrb.mxu2 %vm215_vm2, %v542_v30  ;;  %606 = vmatpush.msrb.mxu3 %v580_v41 }
 0x6fe   :  { %v523_v32 = vsub.f32 1.5, %v522_v28 }
 0x6ff   :  { %v539_v33 = vadd.f32 %v537_v29, %v534_v15  ;;  %830 = vmatpush.msra.mxu2 %v1292_v4 }
 0x700   :  { %v524_v34 = vmul.f32 %v1016_v7, %v523_v32 }
 0x701   :  { %940 = vmatmul.msk.f32.vlgmr.msrb.gmra.mxu2 %vm208_vm10, %v539_v33 }
 0x702   :  { %v528_v35 = vsel %vm527_vm6, %v1016_v7, %v524_v34  ;;  %831 = vmatpush.msra.mxu2 %v1297_v11 }
 0x703   :  { %v530_v12 = vmul.f32 %v528_v35, %v496_v3 }
 0x704   :  { %v583_v48 = vpop.permute.xlu1 %582 }
 0x705   :  { %v535_v36 = vmul.f32 %v532_v6, %v530_v12 }
 0x707   :  { %v540_v40 = vadd.f32 %v537_v29, %v535_v36 }
 0x709   :  { %941 = vmatmul.msk.f32.gmra.mxu2 %vm208_vm10, %v540_v40 }
 0x784   :  { %v571_v43 = vpop.f32.mrf.mxu2 }
 0x785   :  { %v572_v44 = vadd.f32 %v571_v43, %v544_v42 }
 0x787   :  { %v577_v45 = vmax.f32 %v572_v44, 0.0 }
 0x789   :  { %942 = vmatmul.msk.f32.vlgmr.msrb.gmra.mxu3 %vm283_vm12, %v577_v45 }
 0x78c   :  { %v574_v38 = vpop.f32.mrf.mxu2 }
 0x78d   :  { %v575_v46 = vadd.f32 %v574_v38, %v544_v42 }
 0x78f   :  { %v578_v47 = vmax.f32 %v575_v46, 0.0 }
 0x791   :  { %943 = vmatmul.msk.f32.gmra.mxu3 %vm283_vm12, %v578_v47 }
 0x80c   :  { %v608_v39 = vpop.f32.mrf.mxu3 }
 0x80d   :  { %v609_v49 = vadd.f32 %v608_v39, %v583_v48 }
 0x80f   :  { %v614_v50 = vadd.f32 %v609_v49, %v539_v33 }
 0x811   :  { %v616_v51 = vsel %vm208_vm10, %v614_v50, 0.0 }
 0x812   :  { %617 = vadd.xlane.f32.xlu0 %v616_v51 }
 0x814   :  { %v611_v52 = vpop.f32.mrf.mxu3 }
 0x815   :  { %v612_v53 = vadd.f32 %v611_v52, %v583_v48  ;;  %v760_v52 = vperm.slane %v1212_v37, 0 }
 0x817   :  { %v615_v54 = vadd.f32 %v612_v53, %v540_v40 }
 0x819   :  { %v619_v55 = vsel %vm208_vm10, %v615_v54, 0.0 }
 0x81a   :  { %620 = vadd.xlane.f32.xlu2 %v619_v55 }
 0x832   :  { %660 = vrot.lane.b32.xlu2 %v1167_v2, %s1127_s19 }
 0x83a   :  { %672 = vrot.lane.b32.xlu2 %v1212_v37, %s1128_s20 }
 0x842   :  { %711 = vrot.lane.b32.xlu2 %v1297_v11, %s1130_s22 }
 0x885   :  { %v618_v56 = vpop.xlane.xlu0 %617 }
 0x886   :  { %v622_v57 = vmul.f32 %v618_v56, %v1261_v58 }
 0x888   :  { %v624_v24 = vsub.f32 %v614_v50, %v622_v57 }
 0x88a   :  { %v626_v59 = vmul.f32 %v624_v24, %v624_v24 }
 0x88c   :  { %v628_v60 = vsel %vm208_vm10, %v626_v59, 0.0 }
 0x88d   :  { %v621_v31 = vpop.xlane.xlu2 %620  ;;  %629 = vadd.xlane.f32.xlu1 %v628_v60 }
 0x88e   :  { %v623_v61 = vmul.f32 %v621_v31, %v1261_v58 }
 0x890   :  { %v625_v62 = vsub.f32 %v615_v54, %v623_v61 }
 0x892   :  { %v627_v63 = vmul.f32 %v625_v62, %v625_v62 }
 0x894   :  { %v631_v1 = vsel %vm208_vm10, %v627_v63, 0.0 }
 0x895   :  { %632 = vadd.xlane.f32.xlu0 %v631_v1  ;;  %v661_v18 = vpop.permute.xlu2 %660 }
 0x89d   :  { %v673_v29 = vpop.permute.xlu2 %672 }
 0x8a5   :  { %v712_v43 = vpop.permute.xlu2 %711 }
 0x8a6   :  { %665 = vrot.lane.b32.xlu1 %v1167_v2, %s1129_s21 }
 0x8a9   :  { %670 = vrot.lane.b32.xlu0 %v1164_v0, %s1128_s20 }
 0x8ae   :  { %717 = vrot.lane.b32.xlu1 %v67_v10, %s1130_s22 }
 0x8b1   :  { %715 = vrot.lane.b32.xlu0 %v1292_v4, %s1130_s22 }
 0x8b6   :  { %726 = vrot.lane.b32.xlu1 %v1239_v22, %s1131_s23 }
 0x8b9   :  { %713 = vrot.lane.b32.xlu0 %v65_v9, %s1130_s22 }
 0x900   :  { %v630_v3 = vpop.xlane.xlu1 %629 }
 0x901   :  { %v634_v5 = vmul.f32 %v630_v3, %v1261_v58 }
 0x903   :  { %v636_v8 = vadd.f32 1e-05, %v634_v5 }
 0x905   :  { %1017 = vrsqrt.f32 %v636_v8  ;;  %vm644_vm8 = vweird.f32 %v636_v8 }
 0x908   :  { %v633_v0 = vpop.xlane.xlu0 %632 }
 0x909   :  { %v635_v2 = vmul.f32 %v633_v0, %v1261_v58 }
 0x90b   :  { %v1018_v13 = vpop.eup %1017  ;;  %v637_v14 = vadd.f32 1e-05, %v635_v2 }
 0x90c   :  { %v639_v16 = vmul.f32 %v1018_v13, %v636_v8  ;;  %vm645_vm7 = vweird.f32 %v1018_v13 }
 0x90d   :  { %1019 = vrsqrt.f32 %v637_v14  ;;  %vm646_vm9 = vmor %vm644_vm8, %vm645_vm7  ;;  %vm654_vm13 = vweird.f32 %v637_v14  ;;  %vm913_vm8 = vcmask 1024  }
 0x90e   :  { %v640_v17 = vmul.f32 %v1018_v13, %v639_v16 }
 0x910   :  { %v641_v19 = vmul.f32 0.5, %v640_v17 }
 0x912   :  { %v642_v21 = vsub.f32 1.5, %v641_v19 }
 0x913   :  { %v1020_v7 = vpop.eup %1019 }
 0x914   :  { %v649_v20 = vmul.f32 %v1020_v7, %v637_v14  ;;  %v643_v23 = vmul.f32 %v1018_v13, %v642_v21  ;;  %vm655_vm12 = vweird.f32 %v1020_v7 }
 0x915   :  { %vm656_vm14 = vmor %vm654_vm13, %vm655_vm12 }
 0x916   :  { %v650_v25 = vmul.f32 %v1020_v7, %v649_v20  ;;  %v647_v58 = vsel %vm646_vm9, %v1018_v13, %v643_v23  ;;  %v990_v13 = vpack.i.bf16 %v1297_v11, %v1292_v4 }
 0x917   :  { %v658_v26 = vmul.f32 %v647_v58, %v624_v24 }
 0x918   :  { %v651_v6 = vmul.f32 0.5, %v650_v25  ;;  %v666_v27 = vpop.permute.xlu1 %665 }
 0x919   :  { %v663_v28 = vmul.f32 %v661_v18, %v658_v26 }
 0x91a   :  { %v652_v30 = vsub.f32 1.5, %v651_v6 }
 0x91b   :  { %v668_v15 = vadd.f32 %v666_v27, %v663_v28  ;;  %v671_v22 = vpop.permute.xlu0 %670 }
 0x91c   :  { %v653_v32 = vmul.f32 %v1020_v7, %v652_v30  ;;  %v675_v33 = vsel %vm674_vm11, %v671_v22, %v673_v29 }
 0x91d   :  { %944 = vmatpush.msk.msra.mxu0 %vm215_vm2, %v675_v33  ;;  %vm728_vm2 = vcmask 130048  }
 0x91e   :  { %v657_v34 = vsel %vm656_vm14, %v1020_v7, %v653_v32  ;;  %945 = vmatmul.msk.f32.vlgmr.msra.gmra.mxu0 %vm208_vm10, %v668_v15 }
 0x91f   :  { %v659_v35 = vmul.f32 %v657_v34, %v625_v62 }
 0x920   :  { %v718_v42 = vpop.permute.xlu1 %717 }
 0x921   :  { %v664_v12 = vmul.f32 %v661_v18, %v659_v35 }
 0x923   :  { %v669_v36 = vadd.f32 %v666_v27, %v664_v12  ;;  %v716_v40 = vpop.permute.xlu0 %715 }
 0x924   :  { %v721_v46 = vsel %vm719_vm15, %v716_v40, %v718_v42 }
 0x926   :  { %946 = vmatmul.msk.f32.gmra.mxu0 %vm208_vm10, %v669_v36 }
 0x928   :  { %v727_v39 = vpop.permute.xlu1 %726 }
 0x92b   :  { %v714_v44 = vpop.permute.xlu0 %713 }
 0x92c   :  { %v720_v45 = vsel %vm719_vm15, %v712_v43, %v714_v44 }
 0x99b   :  { %v701_v41 = vpop.f32.mrf.mxu0 }
 0x99c   :  { %v724_v48 = vmul.f32 %v720_v45, %v701_v41 }
 0x9a3   :  { %v704_v38 = vpop.f32.mrf.mxu0 }
 0x9a4   :  { %v725_v47 = vmul.f32 %v721_v46, %v704_v38 }
 0x9a6   :  { %745 = vmatpush.msra.mxu1 %v725_v47 }
 0x9a8   :  { %746 = vmatpush.msra.mxu1 %v724_v48 }
 0x9a9   :  { %947 = vmatmul.msk.f32.vlgmr.msra.gmra.mxu1 %vm728_vm2, %v727_v39 }
 0xa26   :  { %v748_v49 = vpop.f32.mrf.mxu1 }
 0xa27   :  { %751 = vrot.lane.b32.xlu2 %v748_v49, %s1125_s17 }
 0xa2f   :  { %762 = vrot.lane.b32.xlu2 %v760_v52, %s1128_s20 }
 0xa37   :  { %886 = vrot.lane.b32.xlu2 %v760_v52, %s1107_s29 }
 0xa81   :  { %v752_v50 = vpop.permute.xlu2 %751 }
 0xa82   :  { %v753_v51 = vadd.f32 %v752_v50, %v748_v49 }
 0xa84   :  { %754 = vrot.lane.b32.xlu0 %v753_v51, %s1132_s24 }
 0xa89   :  { %v763_v56 = vpop.permute.xlu2 %762 }
 0xa8c   :  { %810 = vrot.lane.b32.xlu0 %v760_v52, %s1132_s24 }
 0xaf6   :  { %v755_v53 = vpop.permute.xlu0 %754 }
 0xaf7   :  { %v756_v54 = vadd.f32 %v755_v53, %v753_v51 }
 0xaf9   :  { %757 = vrot.lane.b32.xlu1 %v756_v54, %s1107_s29 }
 0xafe   :  { %v811_v35 = vpop.permute.xlu0 %810 }
 0xb01   :  { %991 = vrot.lane.b32.xlu1 %v990_v13, %s1133_s25 }
 0xb6b   :  { %v758_v55 = vpop.permute.xlu1 %757 }
 0xb6c   :  { %v759_v57 = vadd.f32 %v758_v55, %v756_v54 }
 0xb6e   :  { %v765_v24 = vadd.f32 %v763_v56, %v759_v57 }
 0xb70   :  { %v767_v59 = vmul.f32 0.70710677, %v765_v24  ;;  %v766_v32 = vmul.f32 0.5, %v765_v24 }
 0xb72   :  { %v768_v60 = vmul.f32 %v767_v59, %v767_v59 }
 0xb73   :  { %v992_v39 = vpop.permute.xlu1 %991 }
 0xb74   :  { %v769_v31 = vmin.f32 %v768_v60, 16.0  ;;  %v993_v50 = vunpack.i.l.bf16 %v992_v39  ;;  %v994_v52 = vunpack.i.h.bf16 %v992_v39 }
 0xb76   :  { %v770_v61 = vmul.f32 2.1237322e-06, %v769_v31  ;;  %v781_v62 = vmul.f32 3.8918573e-05, %v769_v31  ;;  %906 = vmatpush.msra.mxu3 %v993_v50 }
 0xb78   :  { %v771_v63 = vadd.f32 0.00028619796, %v770_v61  ;;  %v782_v37 = vadd.f32 0.001143296, %v781_v62  ;;  %907 = vmatpush.msra.mxu3 %v994_v52 }
 0xb7a   :  { %v772_v1 = vmul.f32 %v771_v63, %v769_v31  ;;  %v783_v3 = vmul.f32 %v782_v37, %v769_v31 }
 0xb7c   :  { %v784_v5 = vadd.f32 0.014752088, %v783_v3  ;;  %v773_v8 = vadd.f32 0.0036580483, %v772_v1 }
 0xb7e   :  { %v785_v9 = vmul.f32 %v784_v5, %v769_v31  ;;  %v774_v0 = vmul.f32 %v773_v8, %v769_v31 }
 0xb80   :  { %v786_v10 = vadd.f32 0.112945676, %v785_v9  ;;  %v775_v16 = vadd.f32 0.05243302, %v774_v0 }
 0xb82   :  { %v787_v2 = vmul.f32 %v786_v10, %v769_v31  ;;  %v776_v19 = vmul.f32 %v775_v16, %v769_v31 }
 0xb84   :  { %v788_v14 = vadd.f32 0.4994258, %v787_v2  ;;  %v777_v21 = vadd.f32 0.18741608, %v776_v19 }
 0xb86   :  { %v789_v17 = vmul.f32 %v788_v14, %v769_v31  ;;  %v778_v20 = vmul.f32 %v777_v21, %v769_v31  ;;  %v887_v21 = vpop.permute.xlu2 %886 }
 0xb88   :  { %v790_v18 = vadd.f32 1.0, %v789_v17  ;;  %v779_v26 = vadd.f32 1.1283791, %v778_v20 }
 0xb8a   :  { %1021 = vrcp.f32 %v790_v18  ;;  %v802_v58 = vand.u32 2147483648, %v790_v18  ;;  %v800_v27 = vand.u32 2147483647, %v790_v18  ;;  %vm796_vm0 = vweird.f32 %v790_v18 }
 0xb8b   :  { %v780_v11 = vmul.f32 %v779_v26, %v767_v59 }
 0xb8c   :  { %v803_v4 = vor.u32 1.1754944e-38, %v802_v58  ;;  %vm801_vm3 = vcmp.eq.f32.partialorder %v800_v27, 8.507059e+37 }
 0xb90   :  { %v1022_v7 = vpop.eup %1021 }
 0xb91   :  { %v792_v23 = vmul.f32 %v1022_v7, %v790_v18  ;;  %vm797_vm10 = vweird.f32 %v1022_v7 }
 0xb92   :  { %vm798_vm1 = vmor %vm796_vm0, %vm797_vm10 }
 0xb93   :  { %v793_v25 = vsub.f32 1.0, %v792_v23 }
 0xb95   :  { %v794_v6 = vmul.f32 %v1022_v7, %v793_v25 }
 0xb97   :  { %v795_v28 = vadd.f32 %v1022_v7, %v794_v6 }
 0xb99   :  { %v799_v29 = vsel %vm798_vm1, %v1022_v7, %v795_v28 }
 0xb9a   :  { %v804_v30 = vsel %vm801_vm3, %v803_v4, %v799_v29 }
 0xb9b   :  { %v805_v15 = vmul.f32 %v804_v30, %v780_v11 }
 0xb9d   :  { %v948_v22 = vclamps-f32 %v805_v15, 1.0 }
 0xb9f   :  { %v808_v33 = vadd.f32 1.0, %v948_v22 }
 0xba1   :  { %v809_v34 = vmul.f32 %v808_v33, %v766_v32 }
 0xba3   :  { %949 = vmatmul.msk.f32.vlgmr.msra.gmra.mxu2 %vm728_vm2, %v809_v34 }
 0xc26   :  { %v833_v12 = vpop.f32.mrf.mxu2 }
 0xc27   :  { %v834_v36 = vadd.f32 %v833_v12, %v811_v35 }
 0xc29   :  { %v837_v40 = vmul.f32 0.70710677, %v834_v36  ;;  %v836_v17 = vmul.f32 0.5, %v834_v36 }
 0xc2b   :  { %v838_v41 = vmul.f32 %v837_v40, %v837_v40 }
 0xc2d   :  { %v839_v42 = vmin.f32 %v838_v41, 16.0 }
 0xc2f   :  { %v840_v43 = vmul.f32 2.1237322e-06, %v839_v42  ;;  %v851_v44 = vmul.f32 3.8918573e-05, %v839_v42 }
 0xc31   :  { %v841_v45 = vadd.f32 0.00028619796, %v840_v43  ;;  %v852_v38 = vadd.f32 0.001143296, %v851_v44 }
 0xc33   :  { %v842_v46 = vmul.f32 %v841_v45, %v839_v42  ;;  %v853_v47 = vmul.f32 %v852_v38, %v839_v42 }
 0xc35   :  { %v854_v48 = vadd.f32 0.014752088, %v853_v47  ;;  %v843_v49 = vadd.f32 0.0036580483, %v842_v46 }
 0xc37   :  { %v855_v51 = vmul.f32 %v854_v48, %v839_v42  ;;  %v844_v54 = vmul.f32 %v843_v49, %v839_v42 }
 0xc39   :  { %v856_v53 = vadd.f32 0.112945676, %v855_v51  ;;  %v845_v57 = vadd.f32 0.05243302, %v844_v54 }
 0xc3b   :  { %v857_v55 = vmul.f32 %v856_v53, %v839_v42  ;;  %v846_v60 = vmul.f32 %v845_v57, %v839_v42 }
 0xc3d   :  { %v858_v56 = vadd.f32 0.4994258, %v857_v55  ;;  %v847_v31 = vadd.f32 0.18741608, %v846_v60 }
 0xc3f   :  { %v859_v24 = vmul.f32 %v858_v56, %v839_v42  ;;  %v848_v62 = vmul.f32 %v847_v31, %v839_v42 }
 0xc41   :  { %v860_v59 = vadd.f32 1.0, %v859_v24  ;;  %v849_v3 = vadd.f32 1.1283791, %v848_v62 }
 0xc43   :  { %1023 = vrcp.f32 %v860_v59  ;;  %v872_v1 = vand.u32 2147483648, %v860_v59  ;;  %v870_v8 = vand.u32 2147483647, %v860_v59  ;;  %vm866_vm5 = vweird.f32 %v860_v59 }
 0xc44   :  { %v850_v0 = vmul.f32 %v849_v3, %v837_v40 }
 0xc45   :  { %v873_v10 = vor.u32 1.1754944e-38, %v872_v1  ;;  %vm871_vm7 = vcmp.eq.f32.partialorder %v870_v8, 8.507059e+37 }
 0xc49   :  { %v1024_v61 = vpop.eup %1023 }
 0xc4a   :  { %v862_v63 = vmul.f32 %v1024_v61, %v860_v59  ;;  %vm867_vm4 = vweird.f32 %v1024_v61 }
 0xc4b   :  { %vm868_vm6 = vmor %vm866_vm5, %vm867_vm4 }
 0xc4c   :  { %v863_v37 = vsub.f32 1.0, %v862_v63 }
 0xc4e   :  { %v864_v5 = vmul.f32 %v1024_v61, %v863_v37 }
 0xc50   :  { %v865_v9 = vadd.f32 %v1024_v61, %v864_v5 }
 0xc52   :  { %v869_v2 = vsel %vm868_vm6, %v1024_v61, %v865_v9 }
 0xc53   :  { %v874_v13 = vsel %vm871_vm7, %v873_v10, %v869_v2 }
 0xc54   :  { %v875_v14 = vmul.f32 %v874_v13, %v850_v0 }
 0xc56   :  { %v950_v16 = vclamps-f32 %v875_v14, 1.0 }
 0xc58   :  { %v878_v18 = vadd.f32 1.0, %v950_v16 }
 0xc5a   :  { %v879_v19 = vmul.f32 %v878_v18, %v836_v17 }
 0xc5c   :  { %951 = vmatmul.msk.f32.vlgmr.msra.gmra.mxu3 %vm728_vm2, %v879_v19 }
 0xcdf   :  { %v909_v7 = vpop.f32.mrf.mxu3 }
 0xce0   :  { %v910_v20 = vadd.f32 %v909_v7, %v887_v21 }
 0xce2   :  { %v912_v23 = vmin.f32 %v910_v20, 0.0 }
 0xce4   :  { %914 = vst.msk [vmem:[%s1322_s3] sm:$0x3] %vm913_vm8, %v912_v23 }
 0xce5   :  { %919 = vsyncpa [#allocation3], 1 }
 0xce6   :  { %920 = vsyncpa [#allocation5], 1 }

</bundles_post_ra>
